<compile_context>
chip_gen: v7x
topology: tpu7x:2x2x1
jax: 0.10.0
libtpu: 0.0.40
codegen_flags: <defaults>
</compile_context>

<pallas_src>
import functools

import jax
import jax.numpy as jnp
from jax import lax
from jax.experimental import pallas as pl
from jax.experimental.pallas import tpu as pltpu


def _round_up(n, m):
    return ((n + m - 1) // m) * m


def _vmem_params():
    """(vmem_limit_bytes, per-block f32-equivalent budget) per TPU generation."""
    cap = None
    try:
        cap = getattr(pltpu.get_tpu_info(), "vmem_capacity_bytes", None)
    except Exception:
        cap = None
    if cap is not None and cap < 128 * 1024 * 1024:
        # v7x: 64 MiB physical per TensorCore -> keep the scoped limit <= ~48 MiB.
        return 48 * 1024 * 1024, 5 * 1024 * 1024
    # v5e / v6e: 128 MiB physical -> generous limit, bigger blocks.
    return 64 * 1024 * 1024, 8 * 1024 * 1024


def _pick_cb(B, C, S_pad, align, budget_bytes):
    """Channel-tile size for the single-pass path.

    The tile must be `align`-aligned (8 for 32-bit, 16 for 16-bit dtypes) or
    equal to C.  Pick the largest tile that (a) keeps one (B, cb, S_pad)
    f32-equivalent slab under `budget_bytes`, and (b) yields >= 4 grid steps
    (>= 2 at minimum) so the software pipeline overlaps DMA with compute and
    v7x's two TensorCores both get work; prefer an even step count.
    """
    if C <= align:
        return C
    per_c = B * S_pad * 4
    cb = (budget_bytes // per_c) // align * align
    cb = int(max(align, min(cb, (C // align) * align)))
    for steps in (4, 2):                       # never a 1-step grid if avoidable
        cap = (C // steps) // align * align
        if cap >= align:
            cb = min(cb, cap)
            break
    for cand in (cb, cb - align):              # mild preference for an even grid
        if cand >= align and pl.cdiv(C, cand) % 2 == 0:
            return cand
    return cb


# ------------------------------ single-pass path ------------------------------


def _bin_fused_kernel(rho_ref, x_ref, o_ref, *, eps, s_true, cb, n_c):
    """Fused BatchInstanceNorm for one channel tile.

    rho_ref: (1, n_c*cb, 1) f32, clamped, VMEM-resident across all grid steps.
    x_ref  : (B, cb, S_pad) input block (spatial zero-padded to lane width).
    o_ref  : (B, cb, S_pad) output block.
    """
    if n_c == 1:
        rho = rho_ref[...]                                        # (1, cb, 1)
    else:
        start = pl.multiple_of(pl.program_id(0) * cb, cb)         # cb % 8 == 0
        rho = rho_ref[:, pl.ds(start, cb), :]

    # One-pass sums (E[x], E[x^2]) in f32: no (x - mean)^2 slab temp, and the
    # zero-padded spatial tail contributes nothing, so dividing by the true
    # spatial size keeps the statistics exact.  (Slight cancellation risk vs.
    # the two-pass form; accumulation stays in f32 and var is clamped at 0.)
    inv_n = 1.0 / float(s_true)
    s1 = jnp.sum(x_ref[...].astype(jnp.float32), axis=-1, keepdims=True)
    s2 = jnp.sum(jnp.square(x_ref[...].astype(jnp.float32)), axis=-1,
                 keepdims=True)

    mean_i = s1 * inv_n                                           # (B, cb, 1)
    var_i = jnp.maximum(s2 * inv_n - mean_i * mean_i, 0.0)

    # Batch stats from the instance sums (exact: every (b, c) group has the
    # same count s_true) — no second full-slab reduction pass.
    mean_b = jnp.mean(mean_i, axis=0, keepdims=True)              # (1, cb, 1)
    var_b = jnp.maximum(jnp.mean(s2, axis=0, keepdims=True) * inv_n
                        - mean_b * mean_b, 0.0)

    inv_std_i = lax.rsqrt(var_i + eps)                            # EUP
    inv_std_b = lax.rsqrt(var_b + eps)

    # Fuse rho*(x-mean_b)*inv_b + (1-rho)*(x-mean_i)*inv_i into x*scale + bias.
    scale = rho * inv_std_b + (1.0 - rho) * inv_std_i             # (B, cb, 1)
    bias = -(rho * mean_b * inv_std_b + (1.0 - rho) * mean_i * inv_std_i)

    o_ref[...] = (x_ref[...].astype(jnp.float32) * scale + bias).astype(o_ref.dtype)


def _bin_single_pass(x_bcs, rho_full, eps, align, budget, vmem_limit):
    B, C, S = x_bcs.shape
    S_pad = _round_up(S, 128)                      # lane-dense, unmasked vst
    if S_pad != S:
        x_bcs = jnp.pad(x_bcs, ((0, 0), (0, 0), (0, S_pad - S)))

    cb = _pick_cb(B, C, S_pad, align, budget)
    n_c = pl.cdiv(C, cb)                           # cb need not divide C
    c_pad = n_c * cb
    if c_pad != C:
        rho_full = jnp.pad(rho_full, ((0, 0), (0, c_pad - C), (0, 0)))

    out = pl.pallas_call(
        functools.partial(_bin_fused_kernel, eps=eps, s_true=S, cb=cb, n_c=n_c),
        out_shape=jax.ShapeDtypeStruct((B, C, S_pad), x_bcs.dtype),
        grid_spec=pltpu.PrefetchScalarGridSpec(
            num_scalar_prefetch=0,
            grid=(n_c,),
            in_specs=[
                # Full rho stays resident: constant index_map -> no per-step DMA.
                pl.BlockSpec((1, c_pad, 1), lambda c: (0, 0, 0)),
                pl.BlockSpec((B, cb, S_pad), lambda c: (0, c, 0)),
            ],
            out_specs=pl.BlockSpec((B, cb, S_pad), lambda c: (0, c, 0)),
        ),
        compiler_params=pltpu.CompilerParams(
            dimension_semantics=("parallel",),
            vmem_limit_bytes=vmem_limit,
        ),
    )(rho_full, x_bcs)

    if S_pad != S:
        out = out[:, :, :S]
    return out


# ------------------------------ two-pass fallback ------------------------------


def _stats_kernel(x_ref, s1_ref, s2_ref):
    """Accumulate per-(b, c) sum / sum-of-squares over spatial chunks."""
    si = pl.program_id(1)
    xf = x_ref[...].astype(jnp.float32)                           # (B, cb, Sc)
    p1 = jnp.sum(xf, axis=-1, keepdims=True)                      # (B, cb, 1)
    p2 = jnp.sum(xf * xf, axis=-1, keepdims=True)

    @pl.when(si == 0)
    def _():
        s1_ref[...] = p1
        s2_ref[...] = p2

    @pl.when(si > 0)
    def _():
        s1_ref[...] += p1
        s2_ref[...] += p2


def _affine_kernel(scale_ref, bias_ref, x_ref, o_ref):
    """o = x * scale + bias, streaming over (channel tile, spatial chunk)."""
    o_ref[...] = (x_ref[...].astype(jnp.float32) * scale_ref[...]
                  + bias_ref[...]).astype(o_ref.dtype)


def _bin_two_pass(x_bcs, rho_full, eps, align, budget, vmem_limit):
    B, C, S = x_bcs.shape
    cb = C if C <= align else align
    sc = max(128, (budget // (B * cb * 4)) // 128 * 128)          # lane multiple
    S_pad = _round_up(S, sc)                     # zero pad: sums stay exact
    if S_pad != S:
        x_bcs = jnp.pad(x_bcs, ((0, 0), (0, 0), (0, S_pad - S)))
    n_c = pl.cdiv(C, cb)
    n_s = S_pad // sc

    s1, s2 = pl.pallas_call(
        _stats_kernel,
        out_shape=(jax.ShapeDtypeStruct((B, C, 1), jnp.float32),
                   jax.ShapeDtypeStruct((B, C, 1), jnp.float32)),
        grid_spec=pltpu.PrefetchScalarGridSpec(
            num_scalar_prefetch=0,
            grid=(n_c, n_s),
            in_specs=[pl.BlockSpec((B, cb, sc), lambda c, s: (0, c, s))],
            out_specs=(pl.BlockSpec((B, cb, 1), lambda c, s: (0, c, 0)),
                       pl.BlockSpec((B, cb, 1), lambda c, s: (0, c, 0))),
        ),
        compiler_params=pltpu.CompilerParams(
            dimension_semantics=("parallel", "arbitrary"),
            vmem_limit_bytes=vmem_limit,
        ),
    )(x_bcs)

    # Tiny (B, C, 1) stats math stays in plain XLA.
    inv_n = 1.0 / float(S)
    mean_i = s1 * inv_n
    var_i = jnp.maximum(s2 * inv_n - mean_i * mean_i, 0.0)
    mean_b = jnp.mean(mean_i, axis=0, keepdims=True)
    var_b = jnp.maximum(jnp.mean(s2, axis=0, keepdims=True) * inv_n
                        - mean_b * mean_b, 0.0)
    inv_i = lax.rsqrt(var_i + eps)
    inv_b = lax.rsqrt(var_b + eps)
    scale = rho_full * inv_b + (1.0 - rho_full) * inv_i           # (B, C, 1)
    bias = -(rho_full * mean_b * inv_b + (1.0 - rho_full) * mean_i * inv_i)

    out = pl.pallas_call(
        _affine_kernel,
        out_shape=jax.ShapeDtypeStruct((B, C, S_pad), x_bcs.dtype),
        grid_spec=pltpu.PrefetchScalarGridSpec(
            num_scalar_prefetch=0,
            grid=(n_c, n_s),
            in_specs=[pl.BlockSpec((B, cb, 1), lambda c, s: (0, c, 0)),
                      pl.BlockSpec((B, cb, 1), lambda c, s: (0, c, 0)),
                      pl.BlockSpec((B, cb, sc), lambda c, s: (0, c, s))],
            out_specs=pl.BlockSpec((B, cb, sc), lambda c, s: (0, c, s)),
        ),
        compiler_params=pltpu.CompilerParams(
            dimension_semantics=("parallel", "parallel"),
            vmem_limit_bytes=vmem_limit,
        ),
    )(scale, bias, x_bcs)

    if S_pad != S:
        out = out[:, :, :S]
    return out


# ---------------------------------- wrapper -----------------------------------


def batch_instance_norm(x, rho, eps=1e-5, *, _force_two_pass=False,
                        _budget_bytes=None):
    """BatchInstanceNorm forward (training branch of the PyTorch module).

    x: (B, C, H, W) NCHW.  rho: (C,) or (C, 1, 1).  Returns (B, C, H, W).
    rho is clamped to [0, 1] exactly as the module's forward() does.
    """
    B, C, H, W = x.shape
    S = H * W

    vmem_limit, budget = _vmem_params()
    if _budget_bytes is not None:
        budget = _budget_bytes
    align = 16 if jnp.dtype(x.dtype).itemsize == 2 else 8

    rho_full = jnp.clip(rho.reshape(1, C, 1).astype(jnp.float32), 0.0, 1.0)
    x_bcs = x.reshape(B, C, S)                   # free view of contiguous NCHW

    min_cb = C if C <= align else align
    slab_fits = B * min_cb * _round_up(S, 128) * 4 <= budget

    if slab_fits and not _force_two_pass:
        out = _bin_single_pass(x_bcs, rho_full, eps, align, budget, vmem_limit)
    else:
        out = _bin_two_pass(x_bcs, rho_full, eps, align, budget, vmem_limit)
    return out.reshape(B, C, H, W)


def _reference(x, rho, eps=1e-5):
    """Pure-JAX replica of the PyTorch forward (training branch)."""
    rho = jnp.clip(rho.reshape(1, -1, 1, 1), 0.0, 1.0)
    mean_i = x.mean((2, 3), keepdims=True)
    var_i = ((x - mean_i) ** 2).mean((2, 3), keepdims=True)
    mean_b = x.mean((0, 2, 3), keepdims=True)
    var_b = ((x - mean_b) ** 2).mean((0, 2, 3), keepdims=True)
    x_b = (x - mean_b) / jnp.sqrt(var_b + eps)
    x_i = (x - mean_i) / jnp.sqrt(var_i + eps)
    return rho * x_b + (1.0 - rho) * x_i


if __name__ == "__main__":
    key = jax.random.PRNGKey(0)
    k1, k2, k3, k4 = jax.random.split(key, 4)

    # Case 1: module-sized input -> single-pass fused path.
    B, C, H, W = 2, 4, 16, 16
    x = jax.random.normal(k1, (B, C, H, W), dtype=jnp.float32)
    rho = jax.random.uniform(k2, (C,), dtype=jnp.float32)
    out = jax.block_until_ready(batch_instance_norm(x, rho))
    ref = _reference(x, rho)
    assert out.shape == (B, C, H, W)
    assert jnp.allclose(out, ref, atol=1e-4, rtol=1e-4), (
        float(jnp.max(jnp.abs(out - ref))))

    # Case 2: non-lane-dense spatial (7x7) + channel count not divisible by the
    # tile -> exercises spatial zero-padding, the cdiv channel grid and the
    # multi-step pipeline.
    B2, C2, H2, W2 = 2, 20, 7, 7
    x2 = jax.random.normal(k3, (B2, C2, H2, W2), dtype=jnp.float32)
    rho2 = jax.random.uniform(k4, (C2,), dtype=jnp.float32)
    out2 = jax.block_until_ready(batch_instance_norm(x2, rho2))
    ref2 = _reference(x2, rho2)
    assert jnp.allclose(out2, ref2, atol=1e-4, rtol=1e-4), (
        float(jnp.max(jnp.abs(out2 - ref2))))

    # Case 3: force the two-pass (stats + affine) fallback with a tiny budget so
    # the spatial-chunk accumulation path is exercised at small shapes.
    out3 = jax.block_until_ready(
        batch_instance_norm(x, rho, _force_two_pass=True, _budget_bytes=4096))
    assert jnp.allclose(out3, ref, atol=1e-4, rtol=1e-4), (
        float(jnp.max(jnp.abs(out3 - ref))))

    print("KERNEL_OK")
</pallas_src>

<mosaic_0001>
module attributes {stable_mosaic.version = 11 : i64} {
  func.func @_bin_fused_kernel(%arg0: i32, %arg1: memref<1x4x1xf32, #tpu.memory_space<vmem>>, %arg2: memref<2x4x256xf32, #tpu.memory_space<vmem>>, %arg3: memref<2x4x256xf32, #tpu.memory_space<vmem>>) attributes {dimension_semantics = [#tpu.dimension_semantics<parallel>], iteration_bounds = array<i64: 1>, scalar_prefetch = 0 : i64, scratch_operands = 0 : i64, tpu.core_type = #tpu.core_type<tc>, window_params = [{pipeline_mode = #tpu.pipeline_mode<synchronous>, transform_indices = @transform_0, window_bounds = array<i64: 1, 4, 1>}, {transform_indices = @transform_1, window_bounds = array<i64: 2, 4, 256>}, {transform_indices = @transform_2, window_bounds = array<i64: 2, 4, 256>}]} {
    %c0 = arith.constant 0 : index
    %c0_0 = arith.constant 0 : index
    %c0_1 = arith.constant 0 : index
    %0 = vector.load %arg1[%c0, %c0_0, %c0_1] : memref<1x4x1xf32, #tpu.memory_space<vmem>>, vector<1x4x1xf32>
    %c0_2 = arith.constant 0 : index
    %c0_3 = arith.constant 0 : index
    %c0_4 = arith.constant 0 : index
    %1 = vector.load %arg2[%c0_2, %c0_3, %c0_4] : memref<2x4x256xf32, #tpu.memory_space<vmem>>, vector<2x4x256xf32>
    %cst = arith.constant dense<0.000000e+00> : vector<2x4xf32>
    %2 = vector.multi_reduction <add>, %1, %cst [2] : vector<2x4x256xf32> to vector<2x4xf32>
    %3 = vector.shape_cast %2 : vector<2x4xf32> to vector<2x4x1xf32>
    %c0_5 = arith.constant 0 : index
    %c0_6 = arith.constant 0 : index
    %c0_7 = arith.constant 0 : index
    %4 = vector.load %arg2[%c0_5, %c0_6, %c0_7] : memref<2x4x256xf32, #tpu.memory_space<vmem>>, vector<2x4x256xf32>
    %5 = arith.mulf %4, %4 : vector<2x4x256xf32>
    %cst_8 = arith.constant dense<0.000000e+00> : vector<2x4xf32>
    %6 = vector.multi_reduction <add>, %5, %cst_8 [2] : vector<2x4x256xf32> to vector<2x4xf32>
    %7 = vector.shape_cast %6 : vector<2x4xf32> to vector<2x4x1xf32>
    %cst_9 = arith.constant 3.906250e-03 : f32
    %8 = vector.broadcast %cst_9 : f32 to vector<2x4x1xf32>
    %9 = arith.mulf %3, %8 : vector<2x4x1xf32>
    %cst_10 = arith.constant 3.906250e-03 : f32
    %10 = vector.broadcast %cst_10 : f32 to vector<2x4x1xf32>
    %11 = arith.mulf %7, %10 : vector<2x4x1xf32>
    %12 = arith.mulf %9, %9 : vector<2x4x1xf32>
    %13 = arith.subf %11, %12 : vector<2x4x1xf32>
    %cst_11 = arith.constant 0.000000e+00 : f32
    %14 = vector.broadcast %cst_11 : f32 to vector<2x4x1xf32>
    %15 = arith.maximumf %13, %14 : vector<2x4x1xf32>
    %cst_12 = arith.constant dense<0.000000e+00> : vector<4x1xf32>
    %16 = vector.multi_reduction <add>, %9, %cst_12 [0] : vector<2x4x1xf32> to vector<4x1xf32>
    %17 = vector.shape_cast %16 : vector<4x1xf32> to vector<1x4x1xf32>
    %cst_13 = arith.constant 2.000000e+00 : f32
    %18 = vector.broadcast %cst_13 : f32 to vector<1x4x1xf32>
    %19 = arith.divf %17, %18 : vector<1x4x1xf32>
    %cst_14 = arith.constant dense<0.000000e+00> : vector<4x1xf32>
    %20 = vector.multi_reduction <add>, %7, %cst_14 [0] : vector<2x4x1xf32> to vector<4x1xf32>
    %21 = vector.shape_cast %20 : vector<4x1xf32> to vector<1x4x1xf32>
    %cst_15 = arith.constant 2.000000e+00 : f32
    %22 = vector.broadcast %cst_15 : f32 to vector<1x4x1xf32>
    %23 = arith.divf %21, %22 : vector<1x4x1xf32>
    %cst_16 = arith.constant 3.906250e-03 : f32
    %24 = vector.broadcast %cst_16 : f32 to vector<1x4x1xf32>
    %25 = arith.mulf %23, %24 : vector<1x4x1xf32>
    %26 = arith.mulf %19, %19 : vector<1x4x1xf32>
    %27 = arith.subf %25, %26 : vector<1x4x1xf32>
    %cst_17 = arith.constant 0.000000e+00 : f32
    %28 = vector.broadcast %cst_17 : f32 to vector<1x4x1xf32>
    %29 = arith.maximumf %27, %28 : vector<1x4x1xf32>
    %cst_18 = arith.constant 9.99999974E-6 : f32
    %30 = vector.broadcast %cst_18 : f32 to vector<2x4x1xf32>
    %31 = arith.addf %15, %30 : vector<2x4x1xf32>
    %32 = math.rsqrt %31 : vector<2x4x1xf32>
    %cst_19 = arith.constant 9.99999974E-6 : f32
    %33 = vector.broadcast %cst_19 : f32 to vector<1x4x1xf32>
    %34 = arith.addf %29, %33 : vector<1x4x1xf32>
    %35 = math.rsqrt %34 : vector<1x4x1xf32>
    %36 = arith.mulf %0, %35 : vector<1x4x1xf32>
    %cst_20 = arith.constant 1.000000e+00 : f32
    %37 = vector.broadcast %cst_20 : f32 to vector<1x4x1xf32>
    %38 = arith.subf %37, %0 : vector<1x4x1xf32>
    %39 = vector.broadcast %38 : vector<1x4x1xf32> to vector<2x4x1xf32>
    %40 = arith.mulf %39, %32 : vector<2x4x1xf32>
    %41 = vector.broadcast %36 : vector<1x4x1xf32> to vector<2x4x1xf32>
    %42 = arith.addf %41, %40 : vector<2x4x1xf32>
    %43 = arith.mulf %0, %19 : vector<1x4x1xf32>
    %44 = arith.mulf %43, %35 : vector<1x4x1xf32>
    %cst_21 = arith.constant 1.000000e+00 : f32
    %45 = vector.broadcast %cst_21 : f32 to vector<1x4x1xf32>
    %46 = arith.subf %45, %0 : vector<1x4x1xf32>
    %47 = vector.broadcast %46 : vector<1x4x1xf32> to vector<2x4x1xf32>
    %48 = arith.mulf %47, %9 : vector<2x4x1xf32>
    %49 = arith.mulf %48, %32 : vector<2x4x1xf32>
    %50 = vector.broadcast %44 : vector<1x4x1xf32> to vector<2x4x1xf32>
    %51 = arith.addf %50, %49 : vector<2x4x1xf32>
    %cst_22 = arith.constant 0.000000e+00 : f32
    %52 = vector.broadcast %cst_22 : f32 to vector<2x4x1xf32>
    %53 = arith.subf %52, %51 : vector<2x4x1xf32>
    %c0_23 = arith.constant 0 : index
    %c0_24 = arith.constant 0 : index
    %c0_25 = arith.constant 0 : index
    %54 = vector.load %arg2[%c0_23, %c0_24, %c0_25] : memref<2x4x256xf32, #tpu.memory_space<vmem>>, vector<2x4x256xf32>
    %55 = vector.broadcast %42 : vector<2x4x1xf32> to vector<2x4x256xf32>
    %56 = arith.mulf %54, %55 : vector<2x4x256xf32>
    %57 = vector.broadcast %53 : vector<2x4x1xf32> to vector<2x4x256xf32>
    %58 = arith.addf %56, %57 : vector<2x4x256xf32>
    %c0_26 = arith.constant 0 : index
    %c0_27 = arith.constant 0 : index
    %c0_28 = arith.constant 0 : index
    %59 = vector.load %arg3[%c0_26, %c0_27, %c0_28] : memref<2x4x256xf32, #tpu.memory_space<vmem>>, vector<2x4x256xf32>
    tpu.vector_store %arg3[%c0_26, %c0_27, %c0_28], %58 {strides = array<i32>} : memref<2x4x256xf32, #tpu.memory_space<vmem>>, vector<2x4x256xf32>,
    return
  }
  func.func @transform_0(%arg0: i32) -> (i32, i32, i32) {
    %c0_i32 = arith.constant 0 : i32
    %c0_i32_0 = arith.constant 0 : i32
    %c0_i32_1 = arith.constant 0 : i32
    %c0_i32_2 = arith.constant 0 : i32
    return %c0_i32, %c0_i32_0, %c0_i32_1 : i32, i32, i32
  }
  func.func @transform_1(%arg0: i32) -> (i32, i32, i32) {
    %c0_i32 = arith.constant 0 : i32
    %c0_i32_0 = arith.constant 0 : i32
    %c0_i32_1 = arith.constant 0 : i32
    return %c0_i32, %arg0, %c0_i32_0 : i32, i32, i32
  }
  func.func @transform_2(%arg0: i32) -> (i32, i32, i32) {
    %c0_i32 = arith.constant 0 : i32
    %c0_i32_0 = arith.constant 0 : i32
    %c0_i32_1 = arith.constant 0 : i32
    return %c0_i32, %arg0, %c0_i32_0 : i32, i32, i32
  }
}

</mosaic_0001>

<bundles_post_ra>
// kernel: tpu_custom_call.1
= control target key start
LH: loop header
LB: loop body
LE: loop exit
PB: predicated region body
PF: predicated region fallthrough
CT: control target
= control target key end

     0   :  { %7 = vsyncpa [#allocation3], 0  ;;  %s381_s0 = inlined_call_operand.hbm [shape: f32[1,4,1], index: 0, kind: input, shape index: {}]   ;;  %s382_s1 = inlined_call_operand.hbm [shape: f32[2,4,256], index: 1, kind: input, shape index: {}]   ;;  %s383_s2 = inlined_call_operand.hbm [shape: f32[2,4,256], index: 2, kind: output, shape index: {}]  }
   0x1   :  { %8 = vsyncpa [#allocation6], 0 }
   0x2   :  { %9 = vsyncpa [#allocation4], 0  ;;  %s282_s9 = smov [#allocation2]   ;;  %s283_s11 = smov [#allocation5]  }
   0x3   :  { %s16_s10 = sshll.u32 %s282_s9, 4  ;;  %s25_s12 = sshll.u32 %s283_s11, 4  ;;  %s17_s10 = int_to_ptr.vmem [resolvable:$true] %s16_s10  ;;  %s304_s12 = int_to_ptr.vmem [resolvable:$true] %s25_s12 }
   0x4   :  { %s210_s15 = scalar_lea.hbm %s381_s0, 64 }
   0x5   :  { %p211_p0 = scmp.ne.s32.totalorder %s381_s0, %s210_s15  ;;  %p214_p1 = scmp.lt.u32.totalorder %s210_s15, %s381_s0 }
   0x7   :  { %p216_p2 = pnand %p214_p1, %p211_p0 }
   0x9   :  { %219 = shalt.err (!%p216_p2)
}
   0xa   :  { %s220_s20 = scalar_lea.vmem %s17_s10, 64  ;;  %p225_p4 = scmp.lt.s32.totalorder %s17_s10, %s17_s10 }
   0xb   :  { %p221_p3 = scmp.ne.s32.totalorder %s17_s10, %s220_s20  ;;  %p226_p5 = scmp.lt.s32.totalorder %s220_s20, %s220_s20 }
   0xd   :  { %p227_p6 = por %p226_p5, %p225_p4 }
   0xf   :  { %p228_p7 = pnand %p227_p6, %p221_p3 }
  0x11   :  { %231 = shalt.err (!%p228_p7)
}
  0x12   :  { %19 = dma.hbm_to_vmem [thread:$0]  %s381_s0, 64, %s17_s10, [#allocation3]  }
  0x13   :  { %s232_s25 = scalar_lea.hbm %s382_s1, 256 }
  0x14   :  { %p233_p8 = scmp.ne.s32.totalorder %s382_s1, %s232_s25  ;;  %p236_p9 = scmp.lt.u32.totalorder %s232_s25, %s382_s1 }
  0x16   :  { %p238_p10 = pnand %p236_p9, %p233_p8 }
  0x18   :  { %241 = shalt.err (!%p238_p10)
}
  0x19   :  { %s242_s30 = scalar_lea.vmem %s304_s12, 256  ;;  %p247_p12 = scmp.lt.s32.totalorder %s304_s12, %s304_s12 }
  0x1a   :  { %p243_p11 = scmp.ne.s32.totalorder %s304_s12, %s242_s30  ;;  %p248_p13 = scmp.lt.s32.totalorder %s242_s30, %s242_s30 }
  0x1c   :  { %p249_p0 = por %p248_p13, %p247_p12 }
  0x1e   :  { %p250_p1 = pnand %p249_p0, %p243_p11 }
  0x20   :  { %253 = shalt.err (!%p250_p1)
}
  0x21   :  { %s284_s0 = smov 128   ;;  %s285_s3 = smov 8  }
  0x22   :  { %31 = dma.hbm_to_vmem [thread:$0]  %s382_s1, 256, %s304_s12, [#allocation6], %s284_s0, %s284_s0, %s285_s3  }
  0x23   :  { %276 = dma.done.wait [#allocation3], 64  }
  0x24   :  { %277 = vsyncadd [#allocation3], 4294967232 }
  0x25   :  { %278 = dma.done.wait [#allocation6], 256  }
  0x26   :  { %279 = vsyncadd [#allocation6], 4294967040  ;;  %vm47_vm0 = vcmask 1043456   ;;  %v338_v0 = vld [vmem:[#allocation5] sm:$0xff]  ;;  %v340_v1 = vld [vmem:[#allocation5 + $0x8] sm:$0xff]  ;;  %v286_v20 = vmov 0  }
  0x27   :  { %v43_v2 = vcombine.high %v338_v0, %v338_v0  ;;  %v48_v3 = vsel %vm47_vm0, %v338_v0, 0.0  ;;  %v58_v4 = vmul.f32 %v338_v0, %v338_v0  ;;  %v44_v5 = vcombine.high %v340_v1, %v340_v1  ;;  %201 = vset.pattern.permute.xlu1 %v286_v20  ;;  %200 = vset.pattern.permute.xlu0 %v286_v20  ;;  %v38_v50 = vld [vmem:[#allocation2] sm:$0xf]  ;;  %s288_s1 = smov [#allocation7]  }
  0x28   :  { %v53_v6 = vsel %vm47_vm0, %v340_v1, 0.0  ;;  %v59_v7 = vmul.f32 %v340_v1, %v340_v1  ;;  %v106_v51 = vsub.f32 1.0, %v38_v50  ;;  %s180_s6 = sshll.u32 %s288_s1, 4  ;;  %s181_s6 = int_to_ptr.vmem [resolvable:$true] %s180_s6 }
  0x29   :  { %v49_v8 = vsel %vm47_vm0, %v43_v2, 0.0  ;;  %v62_v9 = vcombine.high %v58_v4, %v58_v4  ;;  %v66_v10 = vsel %vm47_vm0, %v58_v4, 0.0  ;;  %v54_v11 = vsel %vm47_vm0, %v44_v5, 0.0  ;;  %s254_s7 = scalar_lea.vmem %s181_s6, 256  ;;  %p259_p3 = scmp.lt.s32.totalorder %s181_s6, %s181_s6 }
  0x2a   :  { %v50_v12 = vadd.f32 %v49_v8, %v48_v3  ;;  %v63_v13 = vcombine.high %v59_v7, %v59_v7  ;;  %v71_v15 = vsel %vm47_vm0, %v59_v7, 0.0  ;;  %v55_v17 = vadd.f32 %v54_v11, %v53_v6  ;;  %p255_p2 = scmp.ne.s32.totalorder %s181_s6, %s254_s7  ;;  %p260_p4 = scmp.lt.s32.totalorder %s254_s7, %s254_s7 }
  0x2b   :  { %v67_v14 = vsel %vm47_vm0, %v62_v9, 0.0  ;;  %v287_v8 = vmov 839922192  }
  0x2c   :  { %51 = vadd.xlane.f32.xlu0 %v50_v12  ;;  %v68_v16 = vadd.f32 %v67_v14, %v66_v10  ;;  %v72_v18 = vsel %vm47_vm0, %v63_v13, 0.0  ;;  %v130_v9 = vunpack.c.l.s4 %v287_v8  ;;  %v132_v10 = vlaneseq  ;;  %p261_p5 = por %p260_p4, %p259_p3 }
  0x2d   :  { %v73_v19 = vadd.f32 %v72_v18, %v71_v15 }
  0x2e   :  { %69 = vadd.xlane.f32.xlu1 %v68_v16  ;;  %v131_v11 = vunpack.c.0.s8 %v130_v9  ;;  %v133_v12 = vshrl.u32 %v132_v10, 7  ;;  %p262_p6 = pnand %p261_p5, %p255_p2 }
  0x30   :  { %56 = vadd.xlane.f32.xlu0 %v55_v17  ;;  %v134_v13 = vsub.s32 %v131_v11, %v133_v12 }
  0x32   :  { %74 = vadd.xlane.f32.xlu1 %v73_v19 }
  0xb9   :  { %v52_v21 = vpop.xlane.xlu0 %51 }
  0xba   :  { %v76_v22 = vmul.f32 0.00390625, %v52_v21 }
  0xbb   :  { %v70_v23 = vpop.xlane.xlu1 %69 }
  0xbc   :  { %v80_v24 = vmul.f32 %v76_v22, %v76_v22  ;;  %v78_v25 = vmul.f32 0.00390625, %v70_v23  ;;  %v86_v30 = vsel %vm47_vm0, %v76_v22, 0.0  ;;  %v91_v33 = vsel %vm47_vm0, %v70_v23, 0.0 }
  0xbd   :  { %v57_v26 = vpop.xlane.xlu0 %56  ;;  %v113_v54 = vmul.f32 %v106_v51, %v76_v22 }
  0xbe   :  { %v77_v27 = vmul.f32 0.00390625, %v57_v26  ;;  %v82_v28 = vsub.f32 %v78_v25, %v80_v24 }
  0xbf   :  { %v75_v29 = vpop.xlane.xlu1 %74 }
  0xc0   :  { %v81_v31 = vmul.f32 %v77_v27, %v77_v27  ;;  %v87_v32 = vsel %vm47_vm0, %v77_v27, 0.0  ;;  %v79_v35 = vmul.f32 0.00390625, %v75_v29  ;;  %v92_v36 = vsel %vm47_vm0, %v75_v29, 0.0 }
  0xc1   :  { %v88_v34 = vadd.f32 %v87_v32, %v86_v30  ;;  %v93_v37 = vadd.f32 %v92_v36, %v91_v33  ;;  %v84_v38 = vmax.f32 %v82_v28, 0.0  ;;  %v114_v62 = vmul.f32 %v106_v51, %v77_v27 }
  0xc2   :  { %v83_v40 = vsub.f32 %v79_v35, %v81_v31 }
  0xc3   :  { %v90_v39 = vmul.f32 0.5, %v88_v34  ;;  %v94_v41 = vmul.f32 0.5, %v93_v37  ;;  %v99_v45 = vadd.f32 1e-05, %v84_v38 }
  0xc4   :  { %v85_v42 = vmax.f32 %v83_v40, 0.0 }
  0xc5   :  { %v96_v43 = vmul.f32 %v90_v39, %v90_v39  ;;  %v95_v44 = vmul.f32 0.00390625, %v94_v41  ;;  %204 = vrsqrt.f32 %v99_v45  ;;  %v111_v55 = vmul.f32 %v90_v39, %v38_v50 }
  0xc6   :  { %v100_v47 = vadd.f32 1e-05, %v85_v42 }
  0xc7   :  { %v97_v46 = vsub.f32 %v95_v44, %v96_v43 }
  0xc8   :  { %206 = vrsqrt.f32 %v100_v47 }
  0xc9   :  { %v98_v48 = vmax.f32 %v97_v46, 0.0 }
  0xcb   :  { %v103_v49 = vadd.f32 1e-05, %v98_v48 }
  0xcd   :  { %208 = vrsqrt.f32 %v103_v49 }
  0xcf   :  { %v205_v52 = vpop.eup %204 }
  0xd0   :  { %v107_v57 = vmul.f32 %v205_v52, %v106_v51  ;;  %v115_v61 = vmul.f32 %v205_v52, %v113_v54 }
  0xd2   :  { %v207_v53 = vpop.eup %206 }
  0xd3   :  { %v108_v59 = vmul.f32 %v207_v53, %v106_v51  ;;  %v116_v4 = vmul.f32 %v207_v53, %v114_v62 }
  0xd7   :  { %v209_v56 = vpop.eup %208 }
  0xd8   :  { %v105_v58 = vmul.f32 %v209_v56, %v38_v50  ;;  %v112_v60 = vmul.f32 %v209_v56, %v111_v55 }
  0xda   :  { %v110_v63 = vadd.f32 %v108_v59, %v105_v58  ;;  %v109_v2 = vadd.f32 %v107_v57, %v105_v58  ;;  %v117_v3 = vadd.f32 %v115_v61, %v112_v60  ;;  %v118_v6 = vadd.f32 %v116_v4, %v112_v60 }
  0xdc   :  { %127 = vperm.xlu1 %201, %v110_v63   ;;  %123 = vperm.xlu0 %200, %v109_v2   ;;  %v119_v5 = vsub.f32 0.0, %v117_v3  ;;  %v120_v7 = vsub.f32 0.0, %v118_v6 }
  0xe0   :  { %149 = vperm.xlu1 %201, %v119_v5  }
  0xe4   :  { %153 = vperm.xlu1 %201, %v120_v7  }
 0x15b   :  { %v128_v14 = vpop.permute.xlu1 %127  ;;  %v124_v15 = vpop.permute.xlu0 %123 }
 0x15c   :  { %v135_v16 = vrot.slane %v124_v15, %v134_v13  ;;  %v142_v18 = vrot.slane %v128_v14, %v134_v13 }
 0x15e   :  { %v145_v19 = vmul.f32 %v135_v16, %v338_v0  ;;  %v146_v23 = vmul.f32 %v142_v18, %v340_v1 }
 0x15f   :  { %v150_v17 = vpop.permute.xlu1 %149 }
 0x160   :  { %v161_v20 = vrot.slane %v150_v17, %v134_v13 }
 0x162   :  { %v171_v21 = vadd.f32 %v161_v20, %v145_v19 }
 0x163   :  { %v154_v22 = vpop.permute.xlu1 %153 }
 0x164   :  { %173 = vst [vmem:[#allocation7] sm:$0xff] %v171_v21  ;;  %v168_v24 = vrot.slane %v154_v22, %v134_v13 }
 0x166   :  { %v172_v25 = vadd.f32 %v168_v24, %v146_v23 }
 0x168   :  { %174 = vst [vmem:[#allocation7 + $0x8] sm:$0xff] %v172_v25 }
 0x169   :  { %265 = shalt.err (!%p262_p6)
}
 0x16a   :  { %s266_s10 = scalar_lea.hbm %s383_s2, 256 }
 0x16b   :  { %p267_p7 = scmp.ne.s32.totalorder %s383_s2, %s266_s10  ;;  %p270_p8 = scmp.lt.u32.totalorder %s266_s10, %s383_s2 }
 0x16d   :  { %p272_p9 = pnand %p270_p8, %p267_p7 }
 0x16f   :  { %275 = shalt.err (!%p272_p9)
}
 0x170   :  { %186 = dma.vmem_to_hbm [thread:$0]  %s181_s6, 256, %s383_s2, [#allocation4], %s284_s0, %s284_s0, %s285_s3  }
 0x171   :  { %280 = dma.done.wait [#allocation4], 256  }
 0x172   :  { %281 = vsyncadd [#allocation4], 4294967040 }
 0x173   :  { %190 = vsyncpa [#allocation3], 1 }
 0x174   :  { %191 = vsyncpa [#allocation6], 1 }
 0x175   :  { %192 = vsyncpa [#allocation4], 1 }

</bundles_post_ra>
